<compile_context>
chip_gen: v6e
topology: v6e:2x2x1
jax: 0.10.0
libtpu: 0.0.40
codegen_flags: <defaults>
</compile_context>

<pallas_src>
import functools

import jax
import jax.numpy as jnp
from jax.experimental import pallas as pl
from jax.experimental.pallas import tpu as pltpu


def _depth_to_space_kernel(scatter_ref, x_ref, o_ref, *,
                           bs, c_out, h_t, w, w_t, acc_dtype):
    # scatter_ref : (bs, w_t, w_t*bs)      native dtype, resident (constant block)
    # x_ref       : (1, c, h_t, w)         c = bs*bs*c_out, native dtype
    # o_ref       : (1, c_out, h_t, bs*w*bs)
    n_wt = w // w_t
    for b1 in range(bs):
        for wt in range(n_wt):
            w_lo = wt * w_t
            # Interleave the bs channel groups of sub-row b1 along W for this
            # W-tile.  One small 2-D MXU matmul per b2; the b2 contributions
            # hit disjoint lanes, so the adds are exact.
            slab = None
            for b2 in range(bs):
                c_lo = (b1 * bs + b2) * c_out
                chunk = x_ref[0, c_lo:c_lo + c_out, :, w_lo:w_lo + w_t]
                lhs = chunk.reshape(c_out * h_t, w_t)
                part = jnp.dot(lhs, scatter_ref[b2],
                               preferred_element_type=acc_dtype)
                slab = part if slab is None else slab + part
            slab = slab.reshape(c_out, h_t, w_t * bs).astype(o_ref.dtype)
            # Lane- and sublane-dense store at a static lane offset inside the
            # contiguous (bs*w*bs) last dim:  offset = b1*w*bs + w_lo*bs.
            lane_lo = b1 * (w * bs) + w_lo * bs
            o_ref[0, :, :, lane_lo:lane_lo + w_t * bs] = slab


def _vmem_capacity_bytes():
    """Per-core VMEM capacity; conservative 64 MiB (v7x) fallback."""
    try:
        info = pltpu.get_tpu_info()
        for name in ("vmem_capacity_bytes", "vmem_size_bytes", "vmem_bytes"):
            v = getattr(info, name, None)
            if isinstance(v, int) and v > 0:
                return v
    except Exception:
        pass
    return 64 * 1024 * 1024


def _pick_w_tile(w):
    """Input-lane tile for the scatter matmul (caps MXU work and scatter size)."""
    if w <= 128:
        return w
    for cand in (256, 128):
        if w % cand == 0:
            return cand
    for t in range(min(w, 256), 0, -1):
        if w % t == 0:
            return t
    return w


def _pick_h_tile(*, n, c, c_out, h, w, bs, w_t, itemsize, acc_itemsize,
                 vmem_cap):
    """Largest h-tile (multiple of 8, dividing h) whose VMEM footprint fits,
    preferring tiles that keep >= 4 grid steps (2 v7x cores x pipelining)."""
    budget = vmem_cap // 2            # leave half for compiler temporaries

    def pad(v, m):
        return ((v + m - 1) // m) * m

    def vmem_bytes(ht):
        in_b = c * pad(ht, 8) * pad(w, 128) * itemsize
        out_b = c_out * pad(ht, 8) * pad(bs * w * bs, 128) * itemsize
        scat_b = bs * pad(w_t, 8) * pad(w_t * bs, 128) * itemsize
        # In-kernel intermediates (per W-tile): reshaped lhs copy, matmul slab
        # in the accumulation dtype, and the cast slab before the store.
        lhs_b = c_out * pad(ht, 8) * pad(w_t, 128) * itemsize
        slab_b = c_out * pad(ht, 8) * pad(w_t * bs, 128) * acc_itemsize
        cast_b = c_out * pad(ht, 8) * pad(w_t * bs, 128) * itemsize
        return 2 * (in_b + out_b + scat_b) + lhs_b + slab_b + cast_b

    cands = [t for t in range(8, h + 1, 8) if h % t == 0]
    if not cands:
        return h                      # tiny / odd h: use the full dim
    fitting = [t for t in cands if vmem_bytes(t) <= budget] or [cands[0]]
    # TODO(synk): if even the smallest tile overflows the budget (huge c*w),
    # W should additionally be tiled at the grid level, not only in-kernel.
    for min_steps in (4, 2, 1):
        ok = [t for t in fitting if n * (h // t) >= min_steps]
        if ok:
            return max(ok)
    return max(fitting)


def depth_to_space(x, block_size):
    n, c, h, w = x.shape
    bs = block_size
    assert c % (bs * bs) == 0, "channels must be divisible by block_size**2"
    c_out = c // (bs * bs)

    # bf16 accumulates in bf16 (exact: one nonzero product per lane); f32 in f32.
    acc_dtype = jnp.bfloat16 if x.dtype == jnp.bfloat16 else jnp.float32
    acc_itemsize = 2 if acc_dtype == jnp.bfloat16 else 4

    w_t = _pick_w_tile(w)
    vmem_cap = _vmem_capacity_bytes()
    h_t = _pick_h_tile(n=n, c=c, c_out=c_out, h=h, w=w, bs=bs, w_t=w_t,
                       itemsize=x.dtype.itemsize, acc_itemsize=acc_itemsize,
                       vmem_cap=vmem_cap)
    assert h % h_t == 0

    # One-hot lane-scatter matrices, built once per call (tiny, resident):
    # scatter[b2, wi, W] = 1  iff  W == wi*bs + b2, for a w_t-wide input tile.
    wi = jnp.arange(w_t, dtype=jnp.int32)[:, None]
    wl = jnp.arange(w_t * bs, dtype=jnp.int32)[None, :]
    scatter = jnp.stack(
        [(wl == wi * bs + b2) for b2 in range(bs)], axis=0).astype(x.dtype)

    kernel = functools.partial(
        _depth_to_space_kernel, bs=bs, c_out=c_out, h_t=h_t, w=w, w_t=w_t,
        acc_dtype=acc_dtype)

    vmem_limit = max(32 * 1024 * 1024, (vmem_cap * 3) // 4)

    out4 = pl.pallas_call(
        kernel,
        out_shape=jax.ShapeDtypeStruct((n, c_out, h, bs * w * bs), x.dtype),
        grid_spec=pltpu.PrefetchScalarGridSpec(
            num_scalar_prefetch=0,
            grid=(n, h // h_t),
            in_specs=[
                # Scatter: constant block index -> stays resident, no per-step
                # rebuild of the one-hot matrices in the kernel.
                pl.BlockSpec((bs, w_t, w_t * bs), lambda i, j: (0, 0, 0)),
                pl.BlockSpec((1, c, h_t, w), lambda i, j: (i, 0, j, 0)),
            ],
            out_specs=pl.BlockSpec((1, c_out, h_t, bs * w * bs),
                                   lambda i, j: (i, 0, j, 0)),
        ),
        compiler_params=pltpu.CompilerParams(
            dimension_semantics=("parallel", "parallel"),
            vmem_limit_bytes=vmem_limit),
    )(scatter, x)

    # Free (contiguous) view change: the last dim (bs*w*bs) splits as
    # (b1, w, b2) and (h, b1) merges into h*bs, (w, b2) into w*bs.
    return out4.reshape(n, c_out, h * bs, w * bs)


def depth_to_space_reference(x, bs):
    # Pure-JAX reference mirroring the PyTorch forward exactly.
    n, c, h, w = x.shape
    y = x.reshape(n, bs, bs, c // bs**2, h, w)
    y = jnp.transpose(y, (0, 3, 4, 1, 5, 2))
    return y.reshape(n, c // bs**2, h * bs, w * bs)


if __name__ == "__main__":
    key = jax.random.PRNGKey(0)
    n, c, h, w = 2, 8, 16, 16
    block_size = 2
    x = jax.random.normal(key, (n, c, h, w), dtype=jnp.float32)

    out = depth_to_space(x, block_size)
    out = jax.block_until_ready(out)

    ref = depth_to_space_reference(x, block_size)
    assert out.shape == ref.shape, (out.shape, ref.shape)
    assert jnp.allclose(out, ref, rtol=0.0, atol=0.0), "mismatch vs reference"

    print("KERNEL_OK")
</pallas_src>

<mosaic_0001>
module attributes {stable_mosaic.version = 11 : i64} {
  func.func @_depth_to_space_kernel(%arg0: i32, %arg1: i32, %arg2: memref<2x16x32xf32, #tpu.memory_space<vmem>>, %arg3: memref<1x8x8x16xf32, #tpu.memory_space<vmem>>, %arg4: memref<1x2x8x64xf32, #tpu.memory_space<vmem>>) attributes {dimension_semantics = [#tpu.dimension_semantics<parallel>, #tpu.dimension_semantics<parallel>], iteration_bounds = array<i64: 2, 2>, scalar_prefetch = 0 : i64, scratch_operands = 0 : i64, tpu.core_type = #tpu.core_type<tc>, window_params = [{pipeline_mode = #tpu.pipeline_mode<synchronous>, transform_indices = @transform_0, window_bounds = array<i64: 2, 16, 32>}, {transform_indices = @transform_1, window_bounds = array<i64: 1, 8, 8, 16>}, {transform_indices = @transform_2, window_bounds = array<i64: 1, 2, 8, 64>}]} {
    %c0 = arith.constant 0 : index
    %c0_0 = arith.constant 0 : index
    %c0_1 = arith.constant 0 : index
    %c0_2 = arith.constant 0 : index
    %0 = vector.load %arg3[%c0, %c0_0, %c0_1, %c0_2] : memref<1x8x8x16xf32, #tpu.memory_space<vmem>>, vector<1x2x8x16xf32>
    %1 = vector.shape_cast %0 : vector<1x2x8x16xf32> to vector<2x8x16xf32>
    %2 = vector.shape_cast %1 : vector<2x8x16xf32> to vector<16x16xf32>
    %c0_3 = arith.constant 0 : index
    %c0_4 = arith.constant 0 : index
    %c0_5 = arith.constant 0 : index
    %3 = vector.load %arg2[%c0_3, %c0_4, %c0_5] : memref<2x16x32xf32, #tpu.memory_space<vmem>>, vector<1x16x32xf32>
    %4 = vector.shape_cast %3 : vector<1x16x32xf32> to vector<16x32xf32>
    %cst = arith.constant dense<0.000000e+00> : vector<16x32xf32>
    %5 = tpu.matmul %2, %4, %cst {dimension_numbers = #tpu.dot_dimension_numbers<[1], [0], [0], [1], [0, 0, 1, 1], [], []>} : vector<16x16xf32>, vector<16x32xf32>, vector<16x32xf32> -> vector<16x32xf32>
    %c0_6 = arith.constant 0 : index
    %c2 = arith.constant 2 : index
    %c0_7 = arith.constant 0 : index
    %c0_8 = arith.constant 0 : index
    %6 = vector.load %arg3[%c0_6, %c2, %c0_7, %c0_8] : memref<1x8x8x16xf32, #tpu.memory_space<vmem>>, vector<1x2x8x16xf32>
    %7 = vector.shape_cast %6 : vector<1x2x8x16xf32> to vector<2x8x16xf32>
    %8 = vector.shape_cast %7 : vector<2x8x16xf32> to vector<16x16xf32>
    %c1 = arith.constant 1 : index
    %c0_9 = arith.constant 0 : index
    %c0_10 = arith.constant 0 : index
    %9 = vector.load %arg2[%c1, %c0_9, %c0_10] : memref<2x16x32xf32, #tpu.memory_space<vmem>>, vector<1x16x32xf32>
    %10 = vector.shape_cast %9 : vector<1x16x32xf32> to vector<16x32xf32>
    %cst_11 = arith.constant dense<0.000000e+00> : vector<16x32xf32>
    %11 = tpu.matmul %8, %10, %cst_11 {dimension_numbers = #tpu.dot_dimension_numbers<[1], [0], [0], [1], [0, 0, 1, 1], [], []>} : vector<16x16xf32>, vector<16x32xf32>, vector<16x32xf32> -> vector<16x32xf32>
    %12 = arith.addf %5, %11 : vector<16x32xf32>
    %13 = vector.shape_cast %12 : vector<16x32xf32> to vector<2x8x32xf32>
    %c0_12 = arith.constant 0 : index
    %c0_13 = arith.constant 0 : index
    %c0_14 = arith.constant 0 : index
    %c0_15 = arith.constant 0 : index
    %14 = vector.load %arg4[%c0_12, %c0_13, %c0_14, %c0_15] : memref<1x2x8x64xf32, #tpu.memory_space<vmem>>, vector<1x2x8x32xf32>
    %15 = vector.shape_cast %14 : vector<1x2x8x32xf32> to vector<2x8x32xf32>
    %16 = vector.shape_cast %13 : vector<2x8x32xf32> to vector<1x2x8x32xf32>
    tpu.vector_store %arg4[%c0_12, %c0_13, %c0_14, %c0_15], %16 {strides = array<i32>} : memref<1x2x8x64xf32, #tpu.memory_space<vmem>>, vector<1x2x8x32xf32>,
    %c0_16 = arith.constant 0 : index
    %c4 = arith.constant 4 : index
    %c0_17 = arith.constant 0 : index
    %c0_18 = arith.constant 0 : index
    %17 = vector.load %arg3[%c0_16, %c4, %c0_17, %c0_18] : memref<1x8x8x16xf32, #tpu.memory_space<vmem>>, vector<1x2x8x16xf32>
    %18 = vector.shape_cast %17 : vector<1x2x8x16xf32> to vector<2x8x16xf32>
    %19 = vector.shape_cast %18 : vector<2x8x16xf32> to vector<16x16xf32>
    %c0_19 = arith.constant 0 : index
    %c0_20 = arith.constant 0 : index
    %c0_21 = arith.constant 0 : index
    %20 = vector.load %arg2[%c0_19, %c0_20, %c0_21] : memref<2x16x32xf32, #tpu.memory_space<vmem>>, vector<1x16x32xf32>
    %21 = vector.shape_cast %20 : vector<1x16x32xf32> to vector<16x32xf32>
    %cst_22 = arith.constant dense<0.000000e+00> : vector<16x32xf32>
    %22 = tpu.matmul %19, %21, %cst_22 {dimension_numbers = #tpu.dot_dimension_numbers<[1], [0], [0], [1], [0, 0, 1, 1], [], []>} : vector<16x16xf32>, vector<16x32xf32>, vector<16x32xf32> -> vector<16x32xf32>
    %c0_23 = arith.constant 0 : index
    %c6 = arith.constant 6 : index
    %c0_24 = arith.constant 0 : index
    %c0_25 = arith.constant 0 : index
    %23 = vector.load %arg3[%c0_23, %c6, %c0_24, %c0_25] : memref<1x8x8x16xf32, #tpu.memory_space<vmem>>, vector<1x2x8x16xf32>
    %24 = vector.shape_cast %23 : vector<1x2x8x16xf32> to vector<2x8x16xf32>
    %25 = vector.shape_cast %24 : vector<2x8x16xf32> to vector<16x16xf32>
    %c1_26 = arith.constant 1 : index
    %c0_27 = arith.constant 0 : index
    %c0_28 = arith.constant 0 : index
    %26 = vector.load %arg2[%c1_26, %c0_27, %c0_28] : memref<2x16x32xf32, #tpu.memory_space<vmem>>, vector<1x16x32xf32>
    %27 = vector.shape_cast %26 : vector<1x16x32xf32> to vector<16x32xf32>
    %cst_29 = arith.constant dense<0.000000e+00> : vector<16x32xf32>
    %28 = tpu.matmul %25, %27, %cst_29 {dimension_numbers = #tpu.dot_dimension_numbers<[1], [0], [0], [1], [0, 0, 1, 1], [], []>} : vector<16x16xf32>, vector<16x32xf32>, vector<16x32xf32> -> vector<16x32xf32>
    %29 = arith.addf %22, %28 : vector<16x32xf32>
    %30 = vector.shape_cast %29 : vector<16x32xf32> to vector<2x8x32xf32>
    %c0_30 = arith.constant 0 : index
    %c0_31 = arith.constant 0 : index
    %c0_32 = arith.constant 0 : index
    %c32 = arith.constant 32 : index
    %31 = vector.load %arg4[%c0_30, %c0_31, %c0_32, %c32] : memref<1x2x8x64xf32, #tpu.memory_space<vmem>>, vector<1x2x8x32xf32>
    %32 = vector.shape_cast %31 : vector<1x2x8x32xf32> to vector<2x8x32xf32>
    %33 = vector.shape_cast %30 : vector<2x8x32xf32> to vector<1x2x8x32xf32>
    tpu.vector_store %arg4[%c0_30, %c0_31, %c0_32, %c32], %33 {strides = array<i32>} : memref<1x2x8x64xf32, #tpu.memory_space<vmem>>, vector<1x2x8x32xf32>,
    return
  }
  func.func @transform_0(%arg0: i32, %arg1: i32) -> (i32, i32, i32) {
    %c0_i32 = arith.constant 0 : i32
    %c0_i32_0 = arith.constant 0 : i32
    %c0_i32_1 = arith.constant 0 : i32
    %c0_i32_2 = arith.constant 0 : i32
    return %c0_i32, %c0_i32_0, %c0_i32_1 : i32, i32, i32
  }
  func.func @transform_1(%arg0: i32, %arg1: i32) -> (i32, i32, i32, i32) {
    %c0_i32 = arith.constant 0 : i32
    %c0_i32_0 = arith.constant 0 : i32
    %c0_i32_1 = arith.constant 0 : i32
    return %arg0, %c0_i32, %arg1, %c0_i32_0 : i32, i32, i32, i32
  }
  func.func @transform_2(%arg0: i32, %arg1: i32) -> (i32, i32, i32, i32) {
    %c0_i32 = arith.constant 0 : i32
    %c0_i32_0 = arith.constant 0 : i32
    %c0_i32_1 = arith.constant 0 : i32
    return %arg0, %c0_i32, %arg1, %c0_i32_0 : i32, i32, i32, i32
  }
}

</mosaic_0001>

<bundles_post_ra>
// kernel: tpu_custom_call.1
= control target key start
LH: loop header
LB: loop body
LE: loop exit
PB: predicated region body
PF: predicated region fallthrough
CT: control target
= control target key end

     0   :  { %s1244_s0 = inlined_call_operand.hbm [shape: f32[2,16,32], index: 0, kind: input, shape index: {}]   ;;  %s1245_s1 = inlined_call_operand.hbm [shape: f32[2,8,16,16], index: 1, kind: input, shape index: {}]   ;;  %s1246_s2 = inlined_call_operand.hbm [shape: f32[2,2,16,64], index: 2, kind: output, shape index: {}]  }
   0x1   :  { %1255 = sst [smem:[#allocation14_spill]] %s1244_s0 }
   0x2   :  { %7 = vsyncpa [#allocation3], 0 }
   0x3   :  { %8 = vsyncpa [#allocation6], 0 }
   0x4   :  { %10 = vsyncpa [#allocation6 + $0x1], 0 }
   0x5   :  { %11 = vsyncpa [#allocation4], 0 }
   0x6   :  { %13 = vsyncpa [#allocation4 + $0x1], 0  ;;  %s1020_s9 = smov 0   ;;  %s1022_s10 = smov 0  }
   0x7   :  { %s1024_s11 = smov 0   ;;  %s1026_s12 = smov 0  }
   0x8   :  { %s1028_s13 = smov 0   ;;  %s1030_s14 = smov 0  }
   0x9   :  { %s1032_s15 = smov 0   ;;  %s1034_s16 = smov 0  }
   0xa LB: > { %1256 = sst [smem:[#allocation11_spill]] %s985_s14  ;;  %s668_s17 = sadd.s32 4294967295, %s993_s16   ;;  %s993_s16 = sphi %s1034_s16, %s19_s16   ;;  %s989_s15 = sphi %s1032_s15, %s1282_s15   ;;  %s985_s14 = sphi %s1030_s14, %s1277_s14   ;;  %s981_s13 = sphi %s1028_s13, %s1281_s13   ;;  %s977_s12 = sphi %s1026_s12, %s1276_s12   ;;  %s973_s11 = sphi %s1024_s11, %s1280_s11   ;;  %s969_s10 = sphi %s1022_s10, %s1279_s10   ;;  %s965_s9 = sphi %s1020_s9, %s1278_s9  }
   0xb   : > { %s669_s18 = sadd.s32 4294967294, %s993_s16   ;;  %p68_p0 = scmp.ne.s32.totalorder %s973_s11, %s969_s10 }
   0xc   : > { %p69_p1 = scmp.eq.s32.totalorder %s993_s16, 0  ;;  %p74_p2 = scmp.ne.s32.totalorder %s969_s10, %s965_s9 }
   0xd   : > { %p1068_p3 = scmp.eq.s32.totalorder %s668_s17, 0  ;;  %p100_p4 = scmp.eq.s32.totalorder %s668_s17, 3 }
   0xe   : > { %p1072_p5 = por %p69_p1, %p68_p0  ;;  %p106_p6 = scmp.eq.s32.totalorder %s669_s18, 3 }
   0xf   : > { %p1078_p7 = por %p1068_p3, %p74_p2  ;;  %p1082_p8 = por %p100_p4, %p68_p0 }
  0x10   : > { %p1086_p9 = por %p106_p6, %p74_p2  ;;  %p670_p10 = scmp.ge.s32.totalorder %s993_s16, 1 }
  0x11   : > { %s1259_s22 = scalar_select %p1078_p7, 1, 0 }
  0x12   : > { %s1260_s23 = scalar_select %p1082_p8, 1, 0 }
  0x13   : > { %s1261_s24 = scalar_select %p1086_p9, 1, 0 }
  0x14   : > { %p113_p11 = scmp.lt.s32.totalorder %s993_s16, 5  ;;  %s995_s26 = smov [#allocation2]  }
  0x15   : > { %1262 = sst [smem:[#allocation12_spill]] %s1261_s24  ;;  %s125_s27 = sshll.u32 %s995_s26, 4  ;;  %s126_s27 = int_to_ptr.vmem [resolvable:$true] %s125_s27 }
  0x16   : > { %p1092_p12 = pnand %p670_p10, %p113_p11  ;;  %p764_p0 = scmp.lt.s32.totalorder %s993_s16, 4 }
  0x17   : > { %s850_s30 = scalar_lea.vmem %s126_s27, 512  ;;  %p858_p9 = scmp.lt.s32.totalorder %s126_s27, %s126_s27 }
  0x18   : > { %s1263_s25 = scalar_select %p1092_p12, 1, 0 }
  0x19   : > { %p751_p13 = pneg %p1092_p12  ;;  %p1107_p2 = pnand %p764_p0, %p1072_p5 }
  0x1a   : > { %p851_p6 = scmp.ne.s32.totalorder %s126_s27, %s850_s30  ;;  %p859_p8 = scmp.lt.s32.totalorder %s850_s30, %s850_s30 }
  0x1b   : > { %p1101_p1 = pnand %p751_p13, %p1068_p3 }
  0x1c   : > { %p860_p7 = por %p859_p8, %p858_p9 }
  0x1d   : > { %p841_p4 = pneg %p1101_p1 }
  0x1f   : > { %p853_p10 = pnand %p851_p6, %p841_p4 }
  0x21   : > { %p854_p11 = pneg %p853_p10 }
  0x23   : > { %p861_p12 = pnand %p860_p7, %p854_p11 }
  0x25   : > { %864 = shalt.err (!%p861_p12)
}
  0x26   : > { %s1250_s3 = smov 128   ;;  %s1251_s4 = smov 8  }
  0x27   : > { %s1266_s0 = sld [smem:[#allocation14_spill]]  ;;  %s28_s7 = sadd.s32 1, %s985_s14 }
  0x28   : > { %p29_p5 = scmp.ge.s32.totalorder %s28_s7, 2  ;;  %s31_s8 = sadd.s32 1, %s989_s15 }
  0x29   : > { %s139_s17 = sand.u32 1, %s973_s11   ;;  %s674_s18 = sshll.u32 %s989_s15, 4 }
  0x2a   : > { %s1284_s7 = smov (%p29_p5, %s28_s7), 0  ;;  %s1286_s8 = smov (!%p29_p5, %s31_s8), %s989_s15 }
  0x2b   : > { %1267 = sst [smem:[#allocation13_spill]] %s1284_s7  ;;  %s57_s21 = ssub.s32 %s985_s14, %s1284_s7 }
  0x2c   : > { %p33_p7 = scmp.ge.s32.totalorder %s1286_s8, 2  ;;  %s673_s26 = sshll.u32 %s139_s17, 6 }
  0x2d   : > { %754 = dma.hbm_to_vmem [thread:$0]  (!%p1101_p1), %s1266_s0, 512, %s126_s27, [#allocation3], %s1250_s3, %s1250_s3, %s1251_s4  }
  0x2e   : > { %s148_s28 = sadd.s32 %s985_s14, %s674_s18  ;;  %s1288_s8 = smov (%p33_p7, %s1286_s8), 0 }
  0x2f   : > { %s675_s30 = sshll.u32 %s148_s28, 7  ;;  %s143_s27 = scalar_lea.vmem [#allocation5], %s673_s26 }
  0x30   : > { %s151_s5 = sshll.u32 %s143_s27, 4  ;;  %s56_s6 = ssub.s32 %s989_s15, %s1288_s8  ;;  %s152_s5 = int_to_ptr.vmem [resolvable:$true] %s151_s5 }
  0x31   : > { %s150_s4 = scalar_lea.hbm %s1245_s1, %s675_s30  ;;  %s58_s0 = sor.u32 %s57_s21, %s56_s6 }
  0x32   : > { %p59_p8 = scmp.eq.s32.totalorder %s58_s0, 0  ;;  %s140_s24 = scalar_lea.sflag [#allocation6], %s139_s17 }
  0x33   : > { %p867_p9 = pneg %p1107_p2  ;;  %s878_s7 = scalar_lea.vmem %s152_s5, 1024 }
  0x34   : > { %p879_p12 = scmp.ne.s32.totalorder %s152_s5, %s878_s7  ;;  %s998_s18 = smov [#allocation5]  }
  0x35   : > { %s883_s14 = sshll.u32 %s998_s18, 4  ;;  %s884_s14 = int_to_ptr.vmem [resolvable:$false] %s883_s14 }
  0x36   : > { %p881_p13 = pnand %p879_p12, %p867_p9  ;;  %s885_s26 = scalar_lea.vmem %s884_s14, 2048 }
  0x37   : > { %p886_p1 = scmp.lt.s32.totalorder %s152_s5, %s884_s14  ;;  %p887_p4 = scmp.lt.s32.totalorder %s885_s26, %s878_s7 }
  0x38   : > { %p882_p0 = pneg %p881_p13 }
  0x39   : > { %p888_p6 = por %p887_p4, %p886_p1 }
  0x3b   : > { %p889_p10 = pnand %p888_p6, %p882_p0 }
  0x3d   : > { %892 = shalt.err (!%p889_p10)
}
  0x3e   : > { %s999_s19 = smov 256   ;;  %s1268_s3 = smov 8  }
  0x3f   : > { %s1269_s17 = smov 128   ;;  %s1270_s21 = sadd.s32 1, %s973_s11 }
  0x40   : > { %758 = dma.hbm_to_vmem [thread:$0]  (!%p1107_p2), %s150_s4, 1024, %s152_s5, %s140_s24, %s999_s19, %s1269_s17, %s1268_s3  }
  0x41   : > { %s1148_s28 = scalar_select %p59_p8, %s973_s11, %s1270_s21  }
  0x42   : > { %p1271_p11 = scmp.ne.s32.totalorder %s1263_s25, 0 }
  0x44   : > { %163 = sbr.rel (%p1271_p11) target bundleno = 421 (0x1a5), region = 28 }
  0x49   : > { %952 = dma.done.wait (%p1068_p3), [#allocation3], 512  }
  0x4a   : > { %954 = vsyncadd (%p1068_p3), [#allocation3], 4294966784  ;;  %s1157_s14 = sand.u32 1, %s969_s10   ;;  %p1272_p2 = scmp.ne.s32.totalorder %s1259_s22, 0 }
  0x4b   : > { %s678_s24 = sshll.u32 %s1157_s14, 6  ;;  %s170_s29 = scalar_lea.sflag [#allocation6], %s1157_s14 }
  0x4c   : > { %s1161_s0 = scalar_lea.vmem [#allocation5], %s678_s24 }
  0x4d   : > { %956 = dma.done.wait (%p1272_p2), %s170_s29, 1024  }
  0x4e   : > { %958 = vsyncadd (%p1272_p2), %s170_s29, 4294966272  ;;  %v203_v0 = vld [vmem:[#allocation2 + $0x18] sm:$0xff]  ;;  %v197_v1 = vld [vmem:[#allocation2 + $0x8] sm:$0xff]  ;;  %vm204_vm0 = vcmask 130048   ;;  %s679_s20 = sshll.u32 %s1157_s14, 4  ;;  %vm367_vm1 = vcmask 261120  }
  0x4f   : > { %v202_v2 = vld [vmem:[#allocation2 + $0x10] sm:$0xff]  ;;  %715 = vmatprep.subr.mxu0 %v203_v0  ;;  %722 = vmatprep.subr.mxu1 %v197_v1  ;;  %v196_v3 = vld [vmem:[#allocation2] sm:$0xff]  ;;  %v681_v6 = vld [vmem:[%s1161_s0 + $0x18] sm:$0xff]  ;;  %s193_s22 = scalar_lea.vmem [#allocation7], %s679_s20  ;;  %s1000_s25 = smov 32   ;;  %vm550_vm2 = vcmask 523520  }
  0x50   : > { %v680_v4 = vld [vmem:[%s1161_s0 + $0x10] sm:$0xff]  ;;  %716 = vmatpush3.msra.mxu0 %v203_v0  ;;  %723 = vmatpush3.msra.mxu1 %v197_v1  ;;  %v194_v5 = vld [vmem:[%s1161_s0] sm:$0xff]  ;;  %v195_v7 = vld [vmem:[%s1161_s0 + $0x8] sm:$0xff]  ;;  %s695_s4 = sshll.u32 %s981_s13, 2  ;;  %s568_s27 = sshll.u32 %s193_s22, 4  ;;  %s1191_s27 = int_to_ptr.vmem [resolvable:$true] %s568_s27 }
  0x51   : > { %717 = vmatprep.subr.mxu0 %v202_v2  ;;  %724 = vmatprep.subr.mxu1 %v196_v3  ;;  %v688_v8 = vld [vmem:[%s1161_s0 + $0x30] sm:$0xff]  ;;  %v686_v9 = vld [vmem:[%s1161_s0 + $0x20] sm:$0xff]  ;;  %v689_v10 = vld [vmem:[%s1161_s0 + $0x38] sm:$0xff]  ;;  %s565_s7 = sadd.s32 %s977_s12, %s695_s4  ;;  %s554_s26 = scalar_lea.sflag [#allocation4], %s1157_s14 }
  0x52   : > { %718 = vmatpush3.msra.mxu0 %v202_v2  ;;  %719 = vmatprep.mubr.msk.f32.mxu0 %vm204_vm0, %v680_v4  ;;  %v687_v11 = vld [vmem:[%s1161_s0 + $0x28] sm:$0xff]  ;;  %s696_s30 = sshll.u32 %s565_s7, 7  ;;  %s893_s13 = scalar_lea.vmem %s1191_s27, 256 }
  0x53   : > { %725 = vmatpush3.msra.mxu1 %v196_v3  ;;  %726 = vmatprep.mubr.msk.f32.mxu1 %vm204_vm0, %v194_v5  ;;  %s1189_s18 = scalar_lea.hbm %s1246_s2, %s696_s30  ;;  %p894_p3 = scmp.ne.s32.totalorder %s1191_s27, %s893_s13 }
  0x54   : > { %720 = vmatmul.mubr.msk.f32.vlgmr.msra.gmra.mxu0 %vm204_vm0, %v681_v6  ;;  %727 = vmatmul.mubr.msk.f32.vlgmr.msra.gmra.mxu1 %vm204_vm0, %v195_v7  ;;  %p1273_p5 = scmp.ne.s32.totalorder %s1260_s23, 0  ;;  %s1001_s12 = smov [#allocation7]  }
  0x55   : > { %729 = vmatprep.subr.mxu0 %v203_v0  ;;  %736 = vmatprep.subr.mxu1 %v197_v1  ;;  %s897_s19 = sshll.u32 %s1001_s12, 4  ;;  %s898_s19 = int_to_ptr.vmem [resolvable:$false] %s897_s19 }
  0x56   : > { %730 = vmatpush3.msra.mxu0 %v203_v0  ;;  %737 = vmatpush3.msra.mxu1 %v197_v1  ;;  %p895_p7 = pnand %p894_p3, %p1273_p5  ;;  %s899_s3 = scalar_lea.vmem %s898_s19, 512 }
  0x57   : > { %731 = vmatprep.subr.mxu0 %v202_v2  ;;  %738 = vmatprep.subr.mxu1 %v196_v3  ;;  %p900_p9 = scmp.lt.s32.totalorder %s1191_s27, %s898_s19  ;;  %p901_p12 = scmp.lt.s32.totalorder %s899_s3, %s893_s13 }
  0x58   : > { %732 = vmatpush3.msra.mxu0 %v202_v2  ;;  %733 = vmatprep.mubr.msk.f32.mxu0 %vm204_vm0, %v688_v8  ;;  %p896_p8 = pneg %p895_p7 }
  0x59   : > { %739 = vmatpush3.msra.mxu1 %v196_v3  ;;  %740 = vmatprep.mubr.msk.f32.mxu1 %vm204_vm0, %v686_v9  ;;  %p902_p13 = por %p901_p12, %p900_p9 }
  0x5a   : > { %734 = vmatmul.mubr.msk.f32.vlgmr.msra.gmra.mxu0 %vm204_vm0, %v689_v10  ;;  %741 = vmatmul.mubr.msk.f32.vlgmr.msra.gmra.mxu1 %vm204_vm0, %v687_v11 }
  0x5b   : > { %p903_p0 = pnand %p902_p13, %p896_p8 }
 0x114   : > { %v721_v12 = vpop.f32.mrf.mxu0  ;;  %v728_v13 = vpop.f32.mrf.mxu1 }
 0x115   : > { %v364_v14 = vadd.f32 %v728_v13, %v721_v12 }
 0x116   : > { %v277_v15 = vpop.f32.mrf.mxu0  ;;  %v358_v16 = vpop.f32.mrf.mxu1 }
 0x117   : > { %369 = vst.msk [vmem:[%s193_s22 + $0x8] sm:$0xff] %vm367_vm1, %v364_v14  ;;  %v359_v17 = vadd.f32 %v358_v16, %v277_v15 }
 0x119   : > { %368 = vst.msk [vmem:[%s193_s22] sm:$0xff] %vm367_vm1, %v359_v17 }
 0x11a   : > { %v735_v18 = vpop.f32.mrf.mxu0  ;;  %v742_v19 = vpop.f32.mrf.mxu1 }
 0x11b   : > { %v539_v23 = vadd.f32 %v742_v19, %v735_v18 }
 0x11c   : > { %v452_v20 = vpop.f32.mrf.mxu0  ;;  %v533_v21 = vpop.f32.mrf.mxu1 }
 0x11d   : > { %v534_v22 = vadd.f32 %v533_v21, %v452_v20 }
 0x11f   : > { %544 = vrot.lane.b32.xlu0 %v534_v22, %s1000_s25 }
 0x123   : > { %546 = vrot.lane.b32.xlu0 %v539_v23, %s1000_s25 }
 0x191   : > { %v545_v24 = vpop.permute.xlu0 %544 }
 0x192   : > { %551 = vst.msk [vmem:[%s193_s22] sm:$0xff] %vm550_vm2, %v545_v24 }
 0x195   : > { %v547_v25 = vpop.permute.xlu0 %546 }
 0x196   : > { %552 = vst.msk [vmem:[%s193_s22 + $0x8] sm:$0xff] %vm550_vm2, %v547_v25 }
 0x197   : > { %906 = shalt.err (!%p903_p0)
}
 0x198   : > { %s907_s17 = scalar_lea.hbm %s1189_s18, 256  ;;  %s911_s29 = scalar_lea.hbm %s1246_s2, 1024 }
 0x199   : > { %p908_p1 = scmp.ne.s32.totalorder %s1189_s18, %s907_s17  ;;  %p912_p10 = scmp.lt.s32.totalorder %s1189_s18, %s1246_s2 }
 0x19a   : > { %p913_p11 = scmp.lt.s32.totalorder %s911_s29, %s907_s17 }
 0x19b   : > { %p909_p4 = pnand %p908_p1, %p1273_p5 }
 0x19c   : > { %p914_p2 = por %p913_p11, %p912_p10 }
 0x19d   : > { %p910_p6 = pneg %p909_p4 }
 0x19f   : > { %p915_p3 = pnand %p914_p2, %p910_p6 }
 0x1a1   : > { %918 = shalt.err (!%p915_p3)
}
 0x1a2   : > { %s1002_s22 = smov 128   ;;  %s1003_s25 = smov 256  }
 0x1a3   : > { %s1004_s4 = smov 8  }
 0x1a4   : > { %749 = dma.vmem_to_hbm [thread:$0]  (%p1273_p5), %s1191_s27, 256, %s1189_s18, %s554_s26, %s1002_s22, %s1003_s25, %s1004_s4  }
 0x1a5 PF: > { %s1274_s7 = sld [smem:[#allocation12_spill]]  ;;  %p766_p7 = scmp.ge.s32.totalorder %s993_s16, 2 }
 0x1a6   : > { %s583_s30 = sand.u32 1, %s965_s9  }
 0x1a7   : > { %s584_s5 = scalar_lea.sflag [#allocation4], %s583_s30 }
 0x1ab   : > { %p1275_p8 = scmp.ne.s32.totalorder %s1274_s7, 0 }
 0x1ad   : > { %p760_p9 = pnand %p766_p7, %p1275_p8 }
 0x1af   : > { %p761_p12 = pneg %p760_p9 }
 0x1b1   : > { %960 = dma.done.wait (%p761_p12), %s584_s5, 256  }
 0x1b2   : > { %962 = vsyncadd (%p761_p12), %s584_s5, 4294967040  ;;  %s19_s16 = sadd.s32 1, %s993_s16   ;;  %s1276_s12 = sld [smem:[#allocation11_spill]] }
 0x1b3   : > { %p16_p13 = scmp.ge.s32.totalorder %s19_s16, 6   ;;  %s1277_s14 = sld [smem:[#allocation13_spill]] }
 0x1b4   : > { %s1278_s9 = smov %s969_s10  ;;  %s1279_s10 = smov %s973_s11 }
 0x1b5   : > { %s1280_s11 = smov %s1148_s28  ;;  %s1281_s13 = smov %s989_s15 }
 0x1b6   : > { %s1282_s15 = smov %s1288_s8  ;;  %18 = sbr.rel (!%p16_p13) target bundleno = 10 (0xa), region = 82 }
 0x1bb   :  { %589 = vsyncpa [#allocation3], 1 }
 0x1bc   :  { %591 = vsyncpa [#allocation3 + $0x1], 1 }
 0x1bd   :  { %592 = vsyncpa [#allocation6], 1 }
 0x1be   :  { %594 = vsyncpa [#allocation6 + $0x1], 1 }
 0x1bf   :  { %595 = vsyncpa [#allocation4], 1 }
 0x1c0   :  { %597 = vsyncpa [#allocation4 + $0x1], 1 }

</bundles_post_ra>
